<compile_context>
chip_gen: v6e
topology: v6e:2x2x1
jax: 0.10.0
libtpu: 0.0.40
codegen_flags: <defaults>
</compile_context>

<pallas_src>
import jax
import jax.numpy as jnp
from jax.experimental import pallas as pl
from jax.experimental.pallas import tpu as pltpu


def _audio_decoder_kernel(z_ref, w_ref, b_ref, s_ref, out_ref):
    # z_ref   : (T_in, C) f32 VMEM  -- one batch element, time-major
    # w_ref   : (1, C)    f32 VMEM  -- 1x1 conv weight (resident across grid)
    # b_ref   : (1,)      f32 SMEM  -- 1x1 conv bias
    # s_ref   : (5,)      f32 SMEM  -- smoother taps (cross-correlation order)
    # out_ref : (T_in, U) f32 VMEM  -- out[m, r] == wav[m*U + r] of this batch
    T_in = out_ref.shape[0]
    U = out_ref.shape[1]

    # --- 1x1 Conv1d projection: h[m] = sum_c z[m, c] * w[c] + bias  -> (T_in, 1)
    h = jnp.sum(z_ref[...] * w_ref[...], axis=1, keepdims=True) + b_ref[0]

    # --- neighbours in the low-rate domain; zero padding of the smoother conv
    #     is exactly "h outside [0, T_in) is zero".
    zpad = jnp.zeros((1, 1), jnp.float32)
    h_left = jnp.concatenate([zpad, h[:-1, :]], axis=0)    # h[m-1]
    h_right = jnp.concatenate([h[1:, :], zpad], axis=0)    # h[m+1]

    # --- closed-form fused nearest-upsample + 5-tap smoother.
    # out[m*U + r] = c_left[r]*h[m-1] + c_mid[r]*h[m] + c_right[r]*h[m+1]
    w0 = s_ref[0]
    w1 = s_ref[1]
    w2 = s_ref[2]
    w3 = s_ref[3]
    w4 = s_ref[4]
    wsum = w0 + w1 + w2 + w3 + w4

    r = jax.lax.broadcasted_iota(jnp.int32, (1, U), 1)             # lane index
    c_left = jnp.where(r == 0, w0 + w1, jnp.where(r == 1, w0, 0.0))
    c_right = jnp.where(r == U - 1, w3 + w4, jnp.where(r == U - 2, w4, 0.0))
    c_mid = wsum - c_left - c_right

    wav = h * c_mid + h_left * c_left + h_right * c_right          # (T_in, U)
    out_ref[...] = jnp.tanh(wav)


def audio_decoder_forward(z, proj_weight, proj_bias, smoother_weight, target_len):
    """
    z               : (B, C, T_in) f32   latent
    proj_weight     : (1, C, 1)    f32   torch Conv1d(latent_ch, 1, 1) weight
    proj_bias       : (1,)         f32   torch Conv1d bias
    smoother_weight : (1, 1, 5)    f32   torch Conv1d(1, 1, 5, bias=False) weight
    returns         : (B, 1, target_len) f32
    """
    B, C, T_in = z.shape
    assert target_len % T_in == 0, "nearest upsample ratio must be an integer"
    U = target_len // T_in
    assert U >= 4, "upsample factor must cover the 5-tap smoother half-width"

    z_t = jnp.transpose(z, (0, 2, 1)).astype(jnp.float32)          # (B, T_in, C)
    w_row = proj_weight.reshape(1, C).astype(jnp.float32)          # (1, C)
    bias = proj_bias.reshape(1).astype(jnp.float32)                # (1,)
    taps = smoother_weight.reshape(5).astype(jnp.float32)          # (5,)

    out = pl.pallas_call(
        _audio_decoder_kernel,
        out_shape=jax.ShapeDtypeStruct((B, T_in, U), jnp.float32),
        grid=(B,),
        in_specs=[
            pl.BlockSpec((None, T_in, C), lambda i: (i, 0, 0)),    # z, per batch
            pl.BlockSpec((1, C), lambda i: (0, 0)),                # proj w, resident
            pl.BlockSpec(memory_space=pltpu.MemorySpace.SMEM),     # proj bias
            pl.BlockSpec(memory_space=pltpu.MemorySpace.SMEM),     # smoother taps
        ],
        out_specs=pl.BlockSpec((None, T_in, U), lambda i: (i, 0, 0)),
        compiler_params=pltpu.CompilerParams(
            dimension_semantics=("parallel",)),
    )(z_t, w_row, bias, taps)

    # (B, T_in, U) row-major == (B, target_len) in the right order.
    return out.reshape(B, 1, target_len)


def _reference(z, proj_weight, proj_bias, smoother_weight, target_len):
    """Pure-JAX replica of AudioDecoder.forward."""
    B, C, T_in = z.shape
    w = proj_weight.reshape(C)
    h = jnp.einsum("bct,c->bt", z, w,
                   precision=jax.lax.Precision.HIGHEST) + proj_bias[0]   # (B, T_in)
    # F.interpolate(mode='nearest') with an exact integer ratio: src = dst // U
    idx = (jnp.arange(target_len) * T_in) // target_len
    up = h[:, idx]                                                       # (B, L)
    upp = jnp.pad(up, ((0, 0), (2, 2)))
    taps = smoother_weight.reshape(5)
    wav = sum(taps[k] * upp[:, k:k + target_len] for k in range(5))
    return jnp.tanh(wav)[:, None, :]                                     # (B, 1, L)


if __name__ == "__main__":
    key = jax.random.PRNGKey(0)
    B, C, T_in = 2, 64, 16          # latent_ch default = 64
    target_len = 2048               # small stand-in for 160000 (U = 128)

    kz, kw, kb = jax.random.split(key, 3)
    z = jax.random.normal(kz, (B, C, T_in), dtype=jnp.float32)
    proj_weight = (jax.random.normal(kw, (1, C, 1), dtype=jnp.float32)
                   / jnp.sqrt(jnp.float32(C)))
    proj_bias = 0.1 * jax.random.normal(kb, (1,), dtype=jnp.float32)
    smoother_weight = jnp.full((1, 1, 5), 0.2, dtype=jnp.float32)   # init = 1/5

    out = audio_decoder_forward(z, proj_weight, proj_bias, smoother_weight,
                                target_len)
    out = jax.block_until_ready(out)

    ref = _reference(z, proj_weight, proj_bias, smoother_weight, target_len)
    assert out.shape == (B, 1, target_len)
    assert jnp.allclose(out, ref, atol=1e-5, rtol=1e-5), "mismatch vs reference"

    print("KERNEL_OK")
</pallas_src>

<mosaic_0001>
module attributes {stable_mosaic.version = 11 : i64} {
  func.func @_audio_decoder_kernel(%arg0: i32, %arg1: memref<1x16x64xf32, #tpu.memory_space<vmem>>, %arg2: memref<1x64xf32, #tpu.memory_space<vmem>>, %arg3: memref<1xf32, #tpu.memory_space<smem>>, %arg4: memref<5xf32, #tpu.memory_space<smem>>, %arg5: memref<1x16x128xf32, #tpu.memory_space<vmem>>) attributes {dimension_semantics = [#tpu.dimension_semantics<parallel>], iteration_bounds = array<i64: 2>, scalar_prefetch = 0 : i64, scratch_operands = 0 : i64, tpu.core_type = #tpu.core_type<tc>, window_params = [{transform_indices = @transform_0, window_bounds = array<i64: 1, 16, 64>}, {pipeline_mode = #tpu.pipeline_mode<synchronous>, transform_indices = @transform_1, window_bounds = array<i64: 1, 64>}, {transform_indices = @transform_2, window_bounds = array<i64: 1>}, {transform_indices = @transform_3, window_bounds = array<i64: 5>}, {transform_indices = @transform_4, window_bounds = array<i64: 1, 16, 128>}]} {
    %c0 = arith.constant 0 : index
    %c0_0 = arith.constant 0 : index
    %c0_1 = arith.constant 0 : index
    %0 = vector.load %arg1[%c0, %c0_0, %c0_1] : memref<1x16x64xf32, #tpu.memory_space<vmem>>, vector<1x16x64xf32>
    %1 = vector.shape_cast %0 : vector<1x16x64xf32> to vector<16x64xf32>
    %c0_2 = arith.constant 0 : index
    %c0_3 = arith.constant 0 : index
    %2 = vector.load %arg2[%c0_2, %c0_3] : memref<1x64xf32, #tpu.memory_space<vmem>>, vector<1x64xf32>
    %3 = vector.broadcast %2 : vector<1x64xf32> to vector<16x64xf32>
    %4 = arith.mulf %1, %3 : vector<16x64xf32>
    %cst = arith.constant dense<0.000000e+00> : vector<16xf32>
    %5 = vector.multi_reduction <add>, %4, %cst [1] : vector<16x64xf32> to vector<16xf32>
    %6 = vector.shape_cast %5 : vector<16xf32> to vector<16x1xf32>
    %c0_4 = arith.constant 0 : index
    %7 = memref.load %arg3[%c0_4] : memref<1xf32, #tpu.memory_space<smem>>
    %8 = vector.broadcast %7 : f32 to vector<16x1xf32>
    %9 = arith.addf %6, %8 : vector<16x1xf32>
    %cst_5 = arith.constant 0.000000e+00 : f32
    %10 = vector.broadcast %cst_5 : f32 to vector<1x1xf32>
    %11 = vector.extract_strided_slice %9 {offsets = [0, 0], sizes = [15, 1], strides = [1, 1]} : vector<16x1xf32> to vector<15x1xf32>
    %12 = tpu.concatenate %10, %11 in 0 : vector<1x1xf32>, vector<15x1xf32> -> vector<16x1xf32>
    %13 = vector.extract_strided_slice %9 {offsets = [1, 0], sizes = [15, 1], strides = [1, 1]} : vector<16x1xf32> to vector<15x1xf32>
    %14 = tpu.concatenate %13, %10 in 0 : vector<15x1xf32>, vector<1x1xf32> -> vector<16x1xf32>
    %c0_6 = arith.constant 0 : index
    %15 = memref.load %arg4[%c0_6] : memref<5xf32, #tpu.memory_space<smem>>
    %c1 = arith.constant 1 : index
    %16 = memref.load %arg4[%c1] : memref<5xf32, #tpu.memory_space<smem>>
    %c2 = arith.constant 2 : index
    %17 = memref.load %arg4[%c2] : memref<5xf32, #tpu.memory_space<smem>>
    %c3 = arith.constant 3 : index
    %18 = memref.load %arg4[%c3] : memref<5xf32, #tpu.memory_space<smem>>
    %c4 = arith.constant 4 : index
    %19 = memref.load %arg4[%c4] : memref<5xf32, #tpu.memory_space<smem>>
    %20 = arith.addf %15, %16 : f32
    %21 = arith.addf %20, %17 : f32
    %22 = arith.addf %21, %18 : f32
    %23 = arith.addf %22, %19 : f32
    %24 = tpu.iota {dimensions = array<i32: 1>} : vector<1x128xi32>
    %c0_i32 = arith.constant 0 : i32
    %25 = vector.broadcast %c0_i32 : i32 to vector<1x128xi32>
    %26 = arith.cmpi eq, %24, %25 : vector<1x128xi32>
    %27 = arith.addf %15, %16 : f32
    %c1_i32 = arith.constant 1 : i32
    %28 = vector.broadcast %c1_i32 : i32 to vector<1x128xi32>
    %29 = arith.cmpi eq, %24, %28 : vector<1x128xi32>
    %cst_7 = arith.constant 0.000000e+00 : f32
    %30 = vector.broadcast %15 : f32 to vector<1x128xf32>
    %31 = vector.broadcast %cst_7 : f32 to vector<1x128xf32>
    %32 = arith.select %29, %30, %31 : vector<1x128xi1>, vector<1x128xf32>
    %33 = vector.broadcast %27 : f32 to vector<1x128xf32>
    %34 = arith.select %26, %33, %32 : vector<1x128xi1>, vector<1x128xf32>
    %c127_i32 = arith.constant 127 : i32
    %35 = vector.broadcast %c127_i32 : i32 to vector<1x128xi32>
    %36 = arith.cmpi eq, %24, %35 : vector<1x128xi32>
    %37 = arith.addf %18, %19 : f32
    %c126_i32 = arith.constant 126 : i32
    %38 = vector.broadcast %c126_i32 : i32 to vector<1x128xi32>
    %39 = arith.cmpi eq, %24, %38 : vector<1x128xi32>
    %cst_8 = arith.constant 0.000000e+00 : f32
    %40 = vector.broadcast %19 : f32 to vector<1x128xf32>
    %41 = vector.broadcast %cst_8 : f32 to vector<1x128xf32>
    %42 = arith.select %39, %40, %41 : vector<1x128xi1>, vector<1x128xf32>
    %43 = vector.broadcast %37 : f32 to vector<1x128xf32>
    %44 = arith.select %36, %43, %42 : vector<1x128xi1>, vector<1x128xf32>
    %45 = vector.broadcast %23 : f32 to vector<1x128xf32>
    %46 = arith.subf %45, %34 : vector<1x128xf32>
    %47 = arith.subf %46, %44 : vector<1x128xf32>
    %48 = vector.broadcast %9 : vector<16x1xf32> to vector<16x128xf32>
    %49 = vector.broadcast %47 : vector<1x128xf32> to vector<16x128xf32>
    %50 = arith.mulf %48, %49 : vector<16x128xf32>
    %51 = vector.broadcast %12 : vector<16x1xf32> to vector<16x128xf32>
    %52 = vector.broadcast %34 : vector<1x128xf32> to vector<16x128xf32>
    %53 = arith.mulf %51, %52 : vector<16x128xf32>
    %54 = arith.addf %50, %53 : vector<16x128xf32>
    %55 = vector.broadcast %14 : vector<16x1xf32> to vector<16x128xf32>
    %56 = vector.broadcast %44 : vector<1x128xf32> to vector<16x128xf32>
    %57 = arith.mulf %55, %56 : vector<16x128xf32>
    %58 = arith.addf %54, %57 : vector<16x128xf32>
    %59 = math.tanh %58 : vector<16x128xf32>
    %c0_9 = arith.constant 0 : index
    %c0_10 = arith.constant 0 : index
    %c0_11 = arith.constant 0 : index
    %60 = vector.load %arg5[%c0_9, %c0_10, %c0_11] : memref<1x16x128xf32, #tpu.memory_space<vmem>>, vector<1x16x128xf32>
    %61 = vector.shape_cast %60 : vector<1x16x128xf32> to vector<16x128xf32>
    %62 = vector.shape_cast %59 : vector<16x128xf32> to vector<1x16x128xf32>
    tpu.vector_store %arg5[%c0_9, %c0_10, %c0_11], %62 {strides = array<i32>} : memref<1x16x128xf32, #tpu.memory_space<vmem>>, vector<1x16x128xf32>,
    return
  }
  func.func @transform_0(%arg0: i32) -> (i32, i32, i32) {
    %c0_i32 = arith.constant 0 : i32
    %c0_i32_0 = arith.constant 0 : i32
    %c0_i32_1 = arith.constant 0 : i32
    return %arg0, %c0_i32, %c0_i32_0 : i32, i32, i32
  }
  func.func @transform_1(%arg0: i32) -> (i32, i32) {
    %c0_i32 = arith.constant 0 : i32
    %c0_i32_0 = arith.constant 0 : i32
    %c0_i32_1 = arith.constant 0 : i32
    return %c0_i32, %c0_i32_0 : i32, i32
  }
  func.func @transform_2(%arg0: i32) -> i32 {
    %c0_i32 = arith.constant 0 : i32
    %c0_i32_0 = arith.constant 0 : i32
    return %c0_i32 : i32
  }
  func.func @transform_3(%arg0: i32) -> i32 {
    %c0_i32 = arith.constant 0 : i32
    %c0_i32_0 = arith.constant 0 : i32
    return %c0_i32 : i32
  }
  func.func @transform_4(%arg0: i32) -> (i32, i32, i32) {
    %c0_i32 = arith.constant 0 : i32
    %c0_i32_0 = arith.constant 0 : i32
    %c0_i32_1 = arith.constant 0 : i32
    return %arg0, %c0_i32, %c0_i32_0 : i32, i32, i32
  }
}

</mosaic_0001>

<bundles_post_ra>
// kernel: tpu_custom_call.1
= control target key start
LH: loop header
LB: loop body
LE: loop exit
PB: predicated region body
PF: predicated region fallthrough
CT: control target
= control target key end

     0   :  { %s853_s0 = inlined_call_operand.hbm [shape: f32[2,16,64], index: 0, kind: input, shape index: {}]   ;;  %s854_s1 = inlined_call_operand.vmem [shape: f32[1,64], index: 1, kind: input, shape index: {}]   ;;  %s855_s2 = inlined_call_operand.<no memory space> [shape: f32[1], index: 2, kind: input, shape index: {}]   ;;  %s856_s3 = inlined_call_operand.vmem [shape: f32[5], index: 3, kind: input, shape index: {}]   ;;  %s857_s4 = inlined_call_operand.hbm [shape: f32[2,16,128], index: 4, kind: output, shape index: {}]  }
   0x1   :  { %9 = sst [smem:[#allocation2]] %s855_s2 }
   0x2   :  { %10 = vsyncpa [#allocation4], 0 }
   0x3   :  { %12 = vsyncpa [#allocation4 + $0x1], 0 }
   0x4   :  { %13 = vsyncpa [#allocation6], 0 }
   0x5   :  { %14 = vsyncpa [#allocation5], 0 }
   0x6   :  { %16 = vsyncpa [#allocation5 + $0x1], 0  ;;  %s665_s17 = smov 0   ;;  %s667_s18 = smov 0  }
   0x7   :  { %s669_s19 = smov 0   ;;  %s671_s20 = smov 0  }
   0x8 LB: > { %s686_s2 = sadd.s32 4294967295, %s627_s20   ;;  %s425_s21 = sadd.s32 4294967294, %s627_s20   ;;  %s627_s20 = sphi %s671_s20, %s879_s20   ;;  %s623_s19 = sphi %s669_s19, %s878_s19   ;;  %s619_s18 = sphi %s667_s18, %s877_s18   ;;  %s615_s17 = sphi %s665_s17, %s876_s17  }
   0x9   : > { %s690_s22 = sadd.s32 1, %s627_s20   ;;  %s29_s23 = sadd.s32 1, %s623_s19 }
   0xa   : > { %s26_s24 = ssub.s32 %s627_s20, %s690_s22  ;;  %p36_p0 = scmp.ne.s32.totalorder %s623_s19, %s619_s18 }
   0xb   : > { %p27_p1 = scmp.eq.s32.totalorder %s26_s24, 0  ;;  %p37_p2 = scmp.eq.s32.totalorder %s627_s20, 0 }
   0xc   : > { %p42_p3 = scmp.ne.s32.totalorder %s619_s18, %s615_s17  ;;  %p859_p4 = scmp.eq.s32.totalorder %s686_s2, 0 }
   0xd   : > { %s702_s25 = scalar_select %p27_p1, %s623_s19, %s29_s23  }
   0xe   : > { %p704_p5 = por %p37_p2, %p36_p0  ;;  %p710_p6 = por %p859_p4, %p42_p3 }
   0xf   : > { %p129_p7 = scmp.eq.s32.totalorder %s686_s2, 1  ;;  %p135_p8 = scmp.eq.s32.totalorder %s425_s21, 1 }
  0x10   : > { %s863_s27 = scalar_select %p710_p6, 1, 0 }
  0x11   : > { %p426_p9 = scmp.ge.s32.totalorder %s627_s20, 1  ;;  %p142_p10 = scmp.lt.s32.totalorder %s627_s20, 3 }
  0x12   : > { %p717_p11 = por %p129_p7, %p36_p0  ;;  %p721_p12 = por %p135_p8, %p42_p3 }
  0x13   : > { %p725_p13 = pnand %p426_p9, %p142_p10  ;;  %s161_s7 = sshll.u32 %s856_s3, 4  ;;  %s162_s7 = int_to_ptr.vmem [resolvable:$true] %s161_s7 }
  0x14   : > { %s864_s28 = scalar_select %p717_p11, 1, 0 }
  0x15   : > { %s865_s29 = scalar_select %p721_p12, 1, 0 }
  0x16   : > { %s866_s30 = scalar_select %p725_p13, 1, 0 }
  0x17   : > { %p456_p1 = pneg %p725_p13  ;;  %p469_p2 = scmp.lt.s32.totalorder %s627_s20, 2 }
  0x18   : > { %s172_s9 = sand.u32 1, %s623_s19   ;;  %s516_s12 = scalar_lea.vmem %s162_s7, 16 }
  0x19   : > { %p738_p7 = pnand %p456_p1, %p859_p4  ;;  %p745_p3 = pnand %p469_p2, %p704_p5 }
  0x1a   : > { %s429_s11 = sshll.u32 %s172_s9, 4  ;;  %p517_p8 = scmp.ne.s32.totalorder %s162_s7, %s516_s12 }
  0x1b   : > { %p518_p9 = pneg %p738_p7  ;;  %p524_p12 = scmp.lt.s32.totalorder %s162_s7, %s162_s7 }
  0x1c   : > { %p525_p11 = scmp.lt.s32.totalorder %s516_s12, %s516_s12 }
  0x1d   : > { %p519_p10 = pnand %p518_p9, %p517_p8 }
  0x1e   : > { %p526_p1 = por %p525_p11, %p524_p12 }
  0x1f   : > { %p520_p0 = pneg %p519_p10 }
  0x21   : > { %p527_p4 = pnand %p526_p1, %p520_p0 }
  0x23   : > { %530 = shalt.err (!%p527_p4)
}
  0x24   : > { %s629_s13 = smov [#allocation7]   ;;  %s446_s14 = sshll.u32 %s627_s20, 8 }
  0x25   : > { %459 = dma.vmem_to_smem (!%p738_p7), %s162_s7, 16, %s629_s13, [#allocation6]  }
  0x26   : > { %s176_s15 = scalar_lea.vmem [#allocation3], %s429_s11  ;;  %s757_s24 = scalar_lea.hbm %s853_s0, %s446_s14 }
  0x27   : > { %s183_s16 = sshll.u32 %s176_s15, 4  ;;  %s761_s26 = scalar_lea.sflag [#allocation4], %s172_s9  ;;  %s759_s16 = int_to_ptr.vmem [resolvable:$true] %s183_s16 }
  0x28   : > { %s531_s5 = scalar_lea.hbm %s757_s24, 256  ;;  %p533_p5 = pneg %p745_p3 }
  0x29   : > { %p532_p4 = scmp.ne.s32.totalorder %s757_s24, %s531_s5  ;;  %s536_s8 = scalar_lea.hbm %s853_s0, 512 }
  0x2a   : > { %p537_p0 = scmp.lt.s32.totalorder %s757_s24, %s853_s0  ;;  %p538_p2 = scmp.lt.s32.totalorder %s536_s8, %s531_s5 }
  0x2b   : > { %p534_p11 = pnand %p533_p5, %p532_p4 }
  0x2c   : > { %p539_p7 = por %p538_p2, %p537_p0 }
  0x2d   : > { %p535_p12 = pneg %p534_p11 }
  0x2f   : > { %p540_p8 = pnand %p539_p7, %p535_p12 }
  0x31   : > { %543 = shalt.err (!%p540_p8)
}
  0x32   : > { %s544_s9 = scalar_lea.vmem %s759_s16, 256  ;;  %s630_s13 = smov [#allocation3]  }
  0x33   : > { %p545_p9 = scmp.ne.s32.totalorder %s759_s16, %s544_s9  ;;  %s549_s14 = sshll.u32 %s630_s13, 4  ;;  %s550_s14 = int_to_ptr.vmem [resolvable:$false] %s549_s14 }
  0x34   : > { %s551_s15 = scalar_lea.vmem %s550_s14, 512  ;;  %p552_p4 = scmp.lt.s32.totalorder %s759_s16, %s550_s14 }
  0x35   : > { %p547_p10 = pnand %p545_p9, %p533_p5  ;;  %p553_p11 = scmp.lt.s32.totalorder %s551_s15, %s544_s9 }
  0x37   : > { %p548_p1 = pneg %p547_p10  ;;  %p554_p6 = por %p553_p11, %p552_p4 }
  0x39   : > { %p555_p13 = pnand %p554_p6, %p548_p1 }
  0x3b   : > { %558 = shalt.err (!%p555_p13)
}
  0x3c   : > { %s631_s21 = smov 128   ;;  %s632_s23 = smov 8  }
  0x3d   : > { %463 = dma.hbm_to_vmem [thread:$0]  (!%p745_p3), %s757_s24, 256, %s759_s16, %s761_s26, %s631_s21, %s631_s21, %s632_s23  }
  0x3e   : > { %p869_p5 = scmp.ne.s32.totalorder %s866_s30, 0 }
  0x3f   : > { %s785_s5 = sand.u32 (!%p869_p5), 1, %s619_s18   ;;  %p870_p6 = scmp.ne.s32.totalorder (!%p869_p5), %s863_s27, 0 }
  0x40   : > { %195 = sbr.rel (%p869_p5) target bundleno = 388 (0x184), region = 36  ;;  %s433_s6 = sshll.u32 (!%p869_p5), %s785_s5, 4 }
  0x41   : > { %s198_s7 = scalar_lea.sflag (!%p869_p5), [#allocation4], %s785_s5  ;;  %s201_s8 = scalar_lea.vmem (!%p869_p5), [#allocation3], %s433_s6 }
  0x45   : > { %602 = dma.done.wait (%p870_p6), %s198_s7, 256  }
  0x46   : > { %604 = vsyncadd (%p870_p6), %s198_s7, 4294967040  ;;  %p871_p13 = scmp.eq.s32.totalorder %s686_s2, 0 }
  0x48   : > { %606 = dma.done.wait (%p871_p13), [#allocation6], 16   ;;  %p872_p3 = pmov %p871_p13 }
  0x4a   : > { %608 = vsyncadd (%p872_p3), [#allocation6], 4294967280 }
  0x4b   : > { %210 = sfence }
  0x4c   : > { %v231_v0 = vld [vmem:[%s201_s8] sm:$0xff]  ;;  %vm242_vm0 = vcmask 523264   ;;  %v232_v2 = vld [vmem:[%s201_s8 + $0x8] sm:$0xff]  ;;  %v633_v7 = vmov 0   ;;  %s249_s27 = sld [smem:[#allocation2]]  ;;  %vm255_vm1 = vcmask 1040384   ;;  %v276_v21 = vlaneseq }
  0x4d   : > { %v436_v1 = vld [vmem:[%s854_s1] ss:$0 sm:$0xff]  ;;  %510 = vset.pattern.permute.xlu1 %v633_v7  ;;  %511 = vset.pattern.permute.xlu0 %v633_v7  ;;  %vm261_vm2 = vcmask 1046528   ;;  %s267_s16 = sld [smem:[#allocation7]]  ;;  %s447_s23 = sshll.u32 %s686_s2, 8 }
  0x4e   : > { %v240_v3 = vmul.f32 %v436_v1, %v231_v0  ;;  %v241_v4 = vmul.f32 %v436_v1, %v232_v2  ;;  %s437_s24 = sld [smem:[#allocation7 + $0x1]]  ;;  %v277_v22 = vand.u32 127, %v276_v21  ;;  %s230_s7 = scalar_lea.vmem [#allocation8], %s433_s6 }
  0x4f   : > { %s438_s26 = sld [smem:[#allocation7 + $0x2]]  ;;  %s340_s8 = sshll.u32 %s230_s7, 4  ;;  %s810_s8 = int_to_ptr.vmem [resolvable:$true] %s340_s8 }
  0x50   : > { %v243_v5 = vsel %vm242_vm0, %v240_v3, 0.0  ;;  %v246_v6 = vsel %vm242_vm0, %v241_v4, 0.0  ;;  %s439_s11 = sld [smem:[#allocation7 + $0x3]]  ;;  %vm279_vm3 = vcmp.eq.s32.totalorder %v277_v22, 1  ;;  %vm278_vm4 = vcmp.eq.s32.totalorder %v277_v22, 0  ;;  %p873_p0 = scmp.ne.s32.totalorder %s864_s28, 0 }
  0x51   : > { %244 = vadd.xlane.f32.xlu0 %v243_v5  ;;  %s440_s9 = sld [smem:[#allocation7 + $0x4]]  ;;  %vm286_vm5 = vcmp.eq.s32.totalorder %v277_v22, 126  ;;  %vm284_vm6 = vcmp.eq.s32.totalorder %v277_v22, 127  ;;  %s634_s2 = smov [#allocation8]  }
  0x52   : > { %v250_v8 = vstv %s249_s27  ;;  %s808_s27 = scalar_lea.hbm %s857_s4, %s447_s23  ;;  %s563_s6 = sshll.u32 %s634_s2, 4  ;;  %s564_s6 = int_to_ptr.vmem [resolvable:$false] %s563_s6 }
  0x53   : > { %v280_v23 = vstv %s267_s16  ;;  %p566_p8 = scmp.lt.s32.totalorder %s810_s8, %s564_s6 }
  0x54   : > { %s272_s12 = sadd.f32 %s437_s24, %s267_s16  ;;  %v281_v24 = vsel %vm279_vm3, %v280_v23, 0.0  ;;  %s327_s16 = scalar_lea.sflag [#allocation5], %s785_s5 }
  0x55   : > { %247 = vadd.xlane.f32.xlu0 %v246_v6  ;;  %s559_s24 = scalar_lea.vmem %s810_s8, 256 }
  0x56   : > { %s273_s13 = sadd.f32 %s438_s26, %s272_s12  ;;  %v282_v25 = vstv %s272_s12  ;;  %p560_p12 = scmp.ne.s32.totalorder %s810_s8, %s559_s24 }
  0x57   : > { %s285_s21 = sadd.f32 %s440_s9, %s439_s11  ;;  %v287_v26 = vstv %s440_s9  ;;  %v283_v27 = vsel %vm278_vm4, %v282_v25, %v281_v24  ;;  %s565_s26 = scalar_lea.vmem %s564_s6, 512 }
  0x58   : > { %s274_s14 = sadd.f32 %s439_s11, %s273_s13  ;;  %v288_v29 = vsel %vm286_vm5, %v287_v26, 0.0  ;;  %p561_p2 = pnand %p560_p12, %p873_p0 }
  0x59   : > { %v289_v30 = vstv %s285_s21  ;;  %p567_p9 = scmp.lt.s32.totalorder %s565_s26, %s559_s24 }
  0x5a   : > { %s275_s15 = sadd.f32 %s440_s9, %s274_s14  ;;  %v290_v32 = vsel %vm284_vm6, %v289_v30, %v288_v29  ;;  %p562_p7 = pneg %p561_p2 }
  0x5b   : > { %p568_p10 = por %p567_p9, %p566_p8 }
  0x5c   : > { %v291_v28 = vstv %s275_s15 }
  0x5d   : > { %v292_v31 = vsub.f32 %v291_v28, %v283_v27  ;;  %p569_p1 = pnand %p568_p10, %p562_p7 }
  0x5f   : > { %v293_v33 = vsub.f32 %v292_v31, %v290_v32 }
  0xda   : > { %v245_v9 = vpop.xlane.xlu0 %244 }
  0xdb   : > { %v251_v10 = vadd.f32 %v250_v8, %v245_v9 }
  0xdd   : > { %v256_v11 = vrot.slane %v251_v10, 7  ;;  %v262_v15 = vrot.slane %v251_v10, 1  ;;  %v294_v36 = vmul.f32 %v293_v33, %v251_v10 }
  0xde   : > { %v248_v12 = vpop.xlane.xlu0 %247 }
  0xdf   : > { %v252_v13 = vadd.f32 %v250_v8, %v248_v12  ;;  %v260_v14 = vsel %vm255_vm1, 0.0, %v256_v11 }
  0xe0   : > { %298 = vperm.xlu1 %510, %v260_v14  }
  0xe1   : > { %v257_v16 = vrot.slane %v252_v13, 7  ;;  %v263_v17 = vrot.slane %v252_v13, 1  ;;  %v295_v43 = vmul.f32 %v293_v33, %v252_v13 }
  0xe3   : > { %v264_v18 = vsel %vm261_vm2, %v262_v15, %v263_v17  ;;  %v258_v19 = vsel %vm255_vm1, %v256_v11, %v257_v16  ;;  %v266_v20 = vsel %vm261_vm2, %v263_v17, 0.0 }
  0xe4   : > { %310 = vperm.xlu0 %511, %v264_v18   ;;  %302 = vperm.xlu1 %510, %v258_v19  }
  0xe8   : > { %315 = vperm.xlu1 %510, %v266_v20  }
 0x15b   : > { %v299_v34 = vpop.permute.xlu1 %298 }
 0x15c   : > { %v305_v35 = vmul.f32 %v299_v34, %v283_v27 }
 0x15e   : > { %v307_v39 = vadd.f32 %v305_v35, %v294_v36 }
 0x15f   : > { %v311_v37 = vpop.permute.xlu0 %310  ;;  %v303_v38 = vpop.permute.xlu1 %302 }
 0x160   : > { %v318_v40 = vmul.f32 %v311_v37, %v290_v32  ;;  %v306_v41 = vmul.f32 %v303_v38, %v283_v27 }
 0x162   : > { %v320_v42 = vadd.f32 %v318_v40, %v307_v39  ;;  %v308_v45 = vadd.f32 %v306_v41, %v295_v43 }
 0x163   : > { %v316_v44 = vpop.permute.xlu1 %315 }
 0x164   : > { %512 = vtanh.f32 %v320_v42  ;;  %v319_v46 = vmul.f32 %v316_v44, %v290_v32 }
 0x166   : > { %v321_v47 = vadd.f32 %v319_v46, %v308_v45 }
 0x168   : > { %514 = vtanh.f32 %v321_v47 }
 0x171   : > { %v513_v48 = vpop.eup %512 }
 0x172   : > { %324 = vst [vmem:[%s230_s7] sm:$0xff] %v513_v48 }
 0x175   : > { %v515_v49 = vpop.eup %514 }
 0x176   : > { %325 = vst [vmem:[%s230_s7 + $0x8] sm:$0xff] %v515_v49 }
 0x177   : > { %572 = shalt.err (!%p569_p1)
}
 0x178   : > { %s573_s11 = scalar_lea.hbm %s808_s27, 256  ;;  %s577_s13 = scalar_lea.hbm %s857_s4, 512 }
 0x179   : > { %p574_p4 = scmp.ne.s32.totalorder %s808_s27, %s573_s11  ;;  %p578_p6 = scmp.lt.s32.totalorder %s808_s27, %s857_s4 }
 0x17a   : > { %p579_p13 = scmp.lt.s32.totalorder %s577_s13, %s573_s11 }
 0x17b   : > { %p575_p11 = pnand %p574_p4, %p873_p0 }
 0x17c   : > { %p580_p3 = por %p579_p13, %p578_p6 }
 0x17d   : > { %p576_p5 = pneg %p575_p11 }
 0x17f   : > { %p581_p12 = pnand %p580_p3, %p576_p5 }
 0x181   : > { %584 = shalt.err (!%p581_p12)
}
 0x182   : > { %s635_s21 = smov 128   ;;  %s636_s23 = smov 8  }
 0x183   : > { %454 = dma.vmem_to_hbm [thread:$0]  (%p873_p0), %s810_s8, 256, %s808_s27, %s327_s16, %s635_s21, %s635_s21, %s636_s23  }
 0x184 PF: > { %s355_s7 = sand.u32 1, %s615_s17   ;;  %p874_p2 = scmp.ne.s32.totalorder %s865_s29, 0 }
 0x185   : > { %p875_p7 = scmp.ge.s32.totalorder %s627_s20, 2  ;;  %s356_s30 = scalar_lea.sflag [#allocation5], %s355_s7 }
 0x187   : > { %p465_p8 = pnand %p875_p7, %p874_p2 }
 0x189   : > { %p466_p9 = pneg %p465_p8 }
 0x18b   : > { %610 = dma.done.wait (%p466_p9), %s356_s30, 256  }
 0x18c   : > { %612 = vsyncadd (%p466_p9), %s356_s30, 4294967040  ;;  %p19_p10 = scmp.ge.s32.totalorder %s690_s22, 4   ;;  %s876_s17 = smov %s619_s18 }
 0x18d   : > { %s877_s18 = smov %s623_s19  ;;  %s878_s19 = smov %s702_s25 }
 0x18e   : > { %s879_s20 = smov %s690_s22  ;;  %21 = sbr.rel (!%p19_p10) target bundleno = 8 (0x8), region = 86 }
 0x193   :  { %361 = vsyncpa [#allocation4], 1 }
 0x194   :  { %363 = vsyncpa [#allocation4 + $0x1], 1 }
 0x195   :  { %364 = vsyncpa [#allocation5], 1 }
 0x196   :  { %366 = vsyncpa [#allocation5 + $0x1], 1 }
 0x197   :  { %367 = vsyncpa [#allocation6], 1 }
 0x198   :  { %369 = vsyncpa [#allocation6 + $0x1], 1 }

</bundles_post_ra>
